<compile_context>
chip_gen: v7x
topology: tpu7x:2x2x1
jax: 0.10.0
libtpu: 0.0.40
codegen_flags: <defaults>
</compile_context>

<pallas_src>
import jax
import jax.numpy as jnp
from jax import lax
from jax.experimental import pallas as pl
from jax.experimental.pallas import tpu as pltpu

_NORM_EPS = 1e-12  # clamp the norm itself (PyTorch-style), not norm^2


def _l2norm_kernel(x_ref, w_ref, xinv_ref, winv_ref, o_ref, acc_ref):
    """One (i, j, k) grid step: accumulate x_blk @ w_blk^T, scale+store at last k."""
    k = pl.program_id(2)

    @pl.when(k == 0)
    def _init():
        acc_ref[...] = jnp.zeros_like(acc_ref)

    # Contract the shared embedding axis directly (no transpose copy); MXU
    # sees the operands in their native dtype, accumulation stays f32.
    acc_ref[...] += lax.dot_general(
        x_ref[...], w_ref[...],
        dimension_numbers=(((1,), (1,)), ((), ())),
        preferred_element_type=jnp.float32,
    )

    @pl.when(k == pl.num_programs(2) - 1)
    def _finalize():
        # O(tm*tn) output scaling by the hoisted reciprocal row norms.
        o_ref[...] = (acc_ref[...] * xinv_ref[...] * winv_ref[...]).astype(o_ref.dtype)


def _round_up(v, m):
    return ((v + m - 1) // m) * m


def _vmem_budget_bytes():
    """~80% of this generation's physical VMEM (64 MiB v7x, 128 MiB v5e/v6e)."""
    try:
        cap = pltpu.get_tpu_info().vmem_capacity_bytes
    except Exception:  # not on TPU / older jax: assume the smallest (v7x) part
        cap = 64 << 20
    return int(cap * 0.8)


def _block_bytes(tm, tn, tk, xb, wb, ob):
    return (2 * tm * tk * xb          # double-buffered x block
            + 2 * tn * tk * wb        # double-buffered w block
            + 2 * (tm + tn) * 4       # double-buffered norm vectors
            + 2 * tm * tn * ob        # double-buffered output block
            + tm * tn * 4)            # f32 accumulator scratch


def _choose_tiles(B, C, E, xb, wb, ob, budget):
    # Dtype-aware sublane rounding: 8 rows (f32), 16 (bf16), 32 (int8/fp8).
    sub_m = max(8, 32 // xb)

    tm, tn = 256, 256
    # Shape-aware asymmetry: cut the number of passes over the streamed operand.
    if B >= 2 * C and B >= 512:
        tm = 512
    if C >= 2 * B and C >= 512:
        tn = 512
    tm = min(tm, _round_up(B, sub_m))
    tn = min(tn, _round_up(C, 128))

    # Keep both v7x TensorCores busy: if the (i, j) grid would be 1x1 but the
    # class axis spans >=2 lane groups, split it into two tiles.
    c128 = _round_up(C, 128)
    if _round_up(B, sub_m) <= tm and c128 <= tn and c128 >= 2 * 128:
        tn = _round_up(c128 // 2, 128)

    # Embedding (K) tiling: prefer full-E blocks; tile only if over budget.
    if E <= 128 or _block_bytes(tm, tn, E, xb, wb, ob) <= budget:
        tk = E
    else:
        n128 = _round_up(E, 128) // 128
        nk = 2
        tk = 128 * ((n128 + nk - 1) // nk)
        while _block_bytes(tm, tn, tk, xb, wb, ob) > budget and tk > 128:
            nk += 1
            tk = 128 * ((n128 + nk - 1) // nk)
        if _block_bytes(tm, tn, tk, xb, wb, ob) > budget:
            # Even tk=128 is too big: shrink the output tile as a last resort.
            tm = min(tm, max(sub_m, 128))
            tn = min(tn, 128)
    return tm, tn, tk


def l2norm_forward(x, w):
    """Cosine-similarity linear layer: x [B, E], w [C, E] -> [B, C]."""
    B, E = x.shape
    C, E2 = w.shape
    assert E == E2, "embedding dims must match"

    xb = jnp.dtype(x.dtype).itemsize
    wb = jnp.dtype(w.dtype).itemsize
    ob = jnp.dtype(x.dtype).itemsize

    budget = _vmem_budget_bytes()
    tm, tn, tk = _choose_tiles(B, C, E, xb, wb, ob, budget)

    # Hoisted reciprocal row norms (pure JAX, O((B+C)*E), once per call;
    # they scale the (tm, tn) output tile inside the kernel).
    x32 = x.astype(jnp.float32)
    w32 = w.astype(jnp.float32)
    x_inv = 1.0 / jnp.maximum(
        jnp.sqrt(jnp.sum(x32 * x32, axis=1, keepdims=True)), _NORM_EPS)   # [B, 1]
    w_inv = (1.0 / jnp.maximum(
        jnp.sqrt(jnp.sum(w32 * w32, axis=1)), _NORM_EPS)).reshape(1, C)   # [1, C]

    B_pad = _round_up(B, tm)
    C_pad = _round_up(C, tn)
    E_pad = E if tk == E else _round_up(E, tk)

    # TODO(synk): for repeated inference the weight padding and w_inv can be
    # hoisted out of the hot path by the caller; kept here to stay self-contained.
    def _pad2(a, r, c):
        pr, pc = r - a.shape[0], c - a.shape[1]
        return a if (pr == 0 and pc == 0) else jnp.pad(a, ((0, pr), (0, pc)))

    x_p = _pad2(x, B_pad, E_pad)
    w_p = _pad2(w, C_pad, E_pad)
    xinv_p = _pad2(x_inv, B_pad, 1)
    winv_p = _pad2(w_inv, 1, C_pad)

    grid = (B_pad // tm, C_pad // tn, E_pad // tk)

    vmem_limit = int(min(max(2 * _block_bytes(tm, tn, tk, xb, wb, ob), 16 << 20),
                         budget))

    out_padded = pl.pallas_call(
        _l2norm_kernel,
        out_shape=jax.ShapeDtypeStruct((B_pad, C_pad), x.dtype),
        grid_spec=pltpu.PrefetchScalarGridSpec(
            num_scalar_prefetch=0,
            grid=grid,
            in_specs=[
                pl.BlockSpec((tm, tk), lambda i, j, k: (i, k)),   # x block
                pl.BlockSpec((tn, tk), lambda i, j, k: (j, k)),   # w block
                pl.BlockSpec((tm, 1), lambda i, j, k: (i, 0)),    # 1/||x_i||
                pl.BlockSpec((1, tn), lambda i, j, k: (0, j)),    # 1/||w_j||
            ],
            out_specs=pl.BlockSpec((tm, tn), lambda i, j, k: (i, j)),
            scratch_shapes=[pltpu.VMEM((tm, tn), jnp.float32)],
        ),
        compiler_params=pltpu.CompilerParams(
            dimension_semantics=("parallel", "parallel", "arbitrary"),
            vmem_limit_bytes=vmem_limit,
        ),
        cost_estimate=pl.CostEstimate(
            flops=2 * B * C * E,
            transcendentals=0,
            bytes_accessed=B * E * xb + C * E * wb + B * C * ob,
        ),
    )(x_p, w_p, xinv_p, winv_p)

    return out_padded[:B, :C]


if __name__ == "__main__":
    batch = 2
    num_embeddings = 32
    num_class = 8

    key = jax.random.PRNGKey(0)
    kx, kw = jax.random.split(key)

    x = jax.random.normal(kx, (batch, num_embeddings), dtype=jnp.float32)
    # nn.Linear(num_embeddings, num_class, bias=False) weight: [C, E].
    w = jax.random.normal(kw, (num_class, num_embeddings), dtype=jnp.float32) * 0.1

    out = jax.block_until_ready(l2norm_forward(x, w))

    # Pure-JAX reference (cosine similarity).
    x_n = x / jnp.linalg.norm(x, axis=1, keepdims=True)
    w_n = w / jnp.linalg.norm(w, axis=1, keepdims=True)
    ref = x_n @ w_n.T

    assert out.shape == (batch, num_class)
    assert jnp.allclose(out, ref, atol=1e-5, rtol=1e-5), (
        f"max abs err = {jnp.max(jnp.abs(out - ref))}"
    )

    print("KERNEL_OK")
</pallas_src>

<mosaic_0001>
module attributes {stable_mosaic.version = 11 : i64} {
  func.func @_l2norm_kernel(%arg0: i32, %arg1: i32, %arg2: i32, %arg3: memref<8x32xf32, #tpu.memory_space<vmem>>, %arg4: memref<128x32xf32, #tpu.memory_space<vmem>>, %arg5: memref<8x1xf32, #tpu.memory_space<vmem>>, %arg6: memref<1x128xf32, #tpu.memory_space<vmem>>, %arg7: memref<8x128xf32, #tpu.memory_space<vmem>>, %arg8: memref<8x128xf32, #tpu.memory_space<vmem>>) attributes {dimension_semantics = [#tpu.dimension_semantics<parallel>, #tpu.dimension_semantics<parallel>, #tpu.dimension_semantics<arbitrary>], iteration_bounds = array<i64: 1, 1, 1>, scalar_prefetch = 0 : i64, scratch_operands = 1 : i64, tpu.core_type = #tpu.core_type<tc>, window_params = [{transform_indices = @transform_0, window_bounds = array<i64: 8, 32>}, {transform_indices = @transform_1, window_bounds = array<i64: 128, 32>}, {transform_indices = @transform_2, window_bounds = array<i64: 8, 1>}, {transform_indices = @transform_3, window_bounds = array<i64: 1, 128>}, {transform_indices = @transform_4, window_bounds = array<i64: 8, 128>}]} {
    %c0_i32 = arith.constant 0 : i32
    %0 = arith.cmpi eq, %arg2, %c0_i32 : i32
    %1 = arith.extui %0 : i1 to i32
    %c0_i32_0 = arith.constant 0 : i32
    %2 = arith.cmpi ne, %1, %c0_i32_0 : i32
    scf.if %2 {
      %cst_10 = arith.constant 0.000000e+00 : f32
      %12 = vector.broadcast %cst_10 : f32 to vector<8x128xf32>
      %c0_11 = arith.constant 0 : index
      %c0_12 = arith.constant 0 : index
      %13 = vector.load %arg8[%c0_11, %c0_12] : memref<8x128xf32, #tpu.memory_space<vmem>>, vector<8x128xf32>
      tpu.vector_store %arg8[%c0_11, %c0_12], %12 {strides = array<i32>} : memref<8x128xf32, #tpu.memory_space<vmem>>, vector<8x128xf32>,
    } else {
    }
    %c0 = arith.constant 0 : index
    %c0_1 = arith.constant 0 : index
    %3 = vector.load %arg8[%c0, %c0_1] : memref<8x128xf32, #tpu.memory_space<vmem>>, vector<8x128xf32>
    %c0_2 = arith.constant 0 : index
    %c0_3 = arith.constant 0 : index
    %4 = vector.load %arg3[%c0_2, %c0_3] : memref<8x32xf32, #tpu.memory_space<vmem>>, vector<8x32xf32>
    %c0_4 = arith.constant 0 : index
    %c0_5 = arith.constant 0 : index
    %5 = vector.load %arg4[%c0_4, %c0_5] : memref<128x32xf32, #tpu.memory_space<vmem>>, vector<128x32xf32>
    %cst = arith.constant dense<0.000000e+00> : vector<8x128xf32>
    %6 = tpu.matmul %4, %5, %cst {dimension_numbers = #tpu.dot_dimension_numbers<[1], [1], [0], [0], [0, 0, 1, 0], [], []>} : vector<8x32xf32>, vector<128x32xf32>, vector<8x128xf32> -> vector<8x128xf32>
    %7 = arith.addf %3, %6 : vector<8x128xf32>
    %c0_6 = arith.constant 0 : index
    %c0_7 = arith.constant 0 : index
    %8 = vector.load %arg8[%c0_6, %c0_7] : memref<8x128xf32, #tpu.memory_space<vmem>>, vector<8x128xf32>
    tpu.vector_store %arg8[%c0_6, %c0_7], %7 {strides = array<i32>} : memref<8x128xf32, #tpu.memory_space<vmem>>, vector<8x128xf32>,
    %c0_i32_8 = arith.constant 0 : i32
    %9 = arith.cmpi eq, %arg2, %c0_i32_8 : i32
    %10 = arith.extui %9 : i1 to i32
    %c0_i32_9 = arith.constant 0 : i32
    %11 = arith.cmpi ne, %10, %c0_i32_9 : i32
    scf.if %11 {
      %c0_10 = arith.constant 0 : index
      %c0_11 = arith.constant 0 : index
      %12 = vector.load %arg8[%c0_10, %c0_11] : memref<8x128xf32, #tpu.memory_space<vmem>>, vector<8x128xf32>
      %c0_12 = arith.constant 0 : index
      %c0_13 = arith.constant 0 : index
      %13 = vector.load %arg5[%c0_12, %c0_13] : memref<8x1xf32, #tpu.memory_space<vmem>>, vector<8x1xf32>
      %14 = vector.broadcast %13 : vector<8x1xf32> to vector<8x128xf32>
      %15 = arith.mulf %12, %14 : vector<8x128xf32>
      %c0_14 = arith.constant 0 : index
      %c0_15 = arith.constant 0 : index
      %16 = vector.load %arg6[%c0_14, %c0_15] : memref<1x128xf32, #tpu.memory_space<vmem>>, vector<1x128xf32>
      %17 = vector.broadcast %16 : vector<1x128xf32> to vector<8x128xf32>
      %18 = arith.mulf %15, %17 : vector<8x128xf32>
      %c0_16 = arith.constant 0 : index
      %c0_17 = arith.constant 0 : index
      %19 = vector.load %arg7[%c0_16, %c0_17] : memref<8x128xf32, #tpu.memory_space<vmem>>, vector<8x128xf32>
      tpu.vector_store %arg7[%c0_16, %c0_17], %18 {strides = array<i32>} : memref<8x128xf32, #tpu.memory_space<vmem>>, vector<8x128xf32>,
    } else {
    }
    return
  }
  func.func @transform_0(%arg0: i32, %arg1: i32, %arg2: i32) -> (i32, i32) {
    %c0_i32 = arith.constant 0 : i32
    return %arg0, %arg2 : i32, i32
  }
  func.func @transform_1(%arg0: i32, %arg1: i32, %arg2: i32) -> (i32, i32) {
    %c0_i32 = arith.constant 0 : i32
    return %arg1, %arg2 : i32, i32
  }
  func.func @transform_2(%arg0: i32, %arg1: i32, %arg2: i32) -> (i32, i32) {
    %c0_i32 = arith.constant 0 : i32
    %c0_i32_0 = arith.constant 0 : i32
    return %arg0, %c0_i32 : i32, i32
  }
  func.func @transform_3(%arg0: i32, %arg1: i32, %arg2: i32) -> (i32, i32) {
    %c0_i32 = arith.constant 0 : i32
    %c0_i32_0 = arith.constant 0 : i32
    return %c0_i32, %arg1 : i32, i32
  }
  func.func @transform_4(%arg0: i32, %arg1: i32, %arg2: i32) -> (i32, i32) {
    %c0_i32 = arith.constant 0 : i32
    return %arg0, %arg1 : i32, i32
  }
}

</mosaic_0001>

<bundles_post_ra>
// kernel: tpu_custom_call.1
= control target key start
LH: loop header
LB: loop body
LE: loop exit
PB: predicated region body
PF: predicated region fallthrough
CT: control target
= control target key end

     0   :  { %vm41_vm0 = vcmask 261120   ;;  %v331_v2 = vmov 0.0|0.0   ;;  %vm332_vm2 = vmmov 0   ;;  %v333_v5 = vmov 0.0   ;;  %s453_s0 = inlined_call_operand.vmem [shape: f32[8,32], index: 0, kind: input, shape index: {}]   ;;  %s454_s1 = inlined_call_operand.vmem [shape: f32[128,32], index: 1, kind: input, shape index: {}]   ;;  %s455_s2 = inlined_call_operand.vmem [shape: f32[8,1], index: 2, kind: input, shape index: {}]   ;;  %s456_s3 = inlined_call_operand.vmem [shape: f32[1,128], index: 3, kind: input, shape index: {}]   ;;  %s457_s4 = inlined_call_operand.hbm [shape: f32[8,128], index: 4, kind: output, shape index: {}]  }
   0x1   :  { %v25_v0 = vld [vmem:[%s454_s1] sm:$0xff]  ;;  %v26_v1 = vld [vmem:[%s454_s1 + $0x8] sm:$0xff]  ;;  %269 = vmatprep.subr.bf16.mxu0 %v331_v2  ;;  %vm369_vm1 = vmpackc.low %vm41_vm0, %vm41_vm0  ;;  %266 = vmatprep.mubr.msk.f32.mxu0 %vm332_vm2, %v333_v5  ;;  %v334_v6 = vmov 0  }
   0x2   :  { %v270_v3 = vpack.c.bf16 %v26_v1, %v25_v0  ;;  %306 = vset.pattern.permute.xlu0 %v334_v6  ;;  %v27_v7 = vld [vmem:[%s454_s1 + $0x10] sm:$0xff]  ;;  %v28_v8 = vld [vmem:[%s454_s1 + $0x18] sm:$0xff]  ;;  %v169_v9 = vld [vmem:[%s455_s2] sm:$0xff] }
   0x4   :  { %272 = vmatpush3.bf16.xpose.msk.msra.mxu0 %vm369_vm1, %v270_v3 }
   0x5   :  { %273 = vmatprep.subr.bf16.mxu0 %v331_v2 }
   0x6   :  { %9 = vsyncpa [#allocation4], 0  ;;  %v274_v10 = vpack.c.bf16 %v28_v8, %v27_v7  ;;  %172 = vperm.xlu0 %306, %v169_v9   ;;  %v29_v11 = vld [vmem:[%s454_s1 + $0x20] sm:$0xff]  ;;  %v30_v12 = vld [vmem:[%s454_s1 + $0x28] sm:$0xff]  ;;  %s335_s26 = smov [#allocation3]  }
   0x7   :  { %v278_v13 = vpack.c.bf16 %v30_v12, %v29_v11  ;;  %v31_v14 = vld [vmem:[%s454_s1 + $0x30] sm:$0xff]  ;;  %v32_v15 = vld [vmem:[%s454_s1 + $0x38] sm:$0xff]  ;;  %v33_v17 = vld [vmem:[%s454_s1 + $0x40] sm:$0xff]  ;;  %s191_s27 = sshll.u32 %s335_s26, 4  ;;  %s192_s27 = int_to_ptr.vmem [resolvable:$true] %s191_s27 }
   0x8   :  { %v282_v16 = vpack.c.bf16 %v32_v15, %v31_v14  ;;  %v34_v18 = vld [vmem:[%s454_s1 + $0x48] sm:$0xff]  ;;  %v35_v20 = vld [vmem:[%s454_s1 + $0x50] sm:$0xff]  ;;  %v36_v21 = vld [vmem:[%s454_s1 + $0x58] sm:$0xff]  ;;  %p312_p1 = scmp.lt.s32.totalorder %s192_s27, %s192_s27 }
   0x9   :  { %v286_v19 = vpack.c.bf16 %v34_v18, %v33_v17  ;;  %v290_v22 = vpack.c.bf16 %v36_v21, %v35_v20  ;;  %v37_v23 = vld [vmem:[%s454_s1 + $0x60] sm:$0xff]  ;;  %v38_v24 = vld [vmem:[%s454_s1 + $0x68] sm:$0xff]  ;;  %v39_v26 = vld [vmem:[%s454_s1 + $0x70] sm:$0xff] }
   0xa   :  { %v294_v25 = vpack.c.bf16 %v38_v24, %v37_v23  ;;  %v40_v27 = vld [vmem:[%s454_s1 + $0x78] sm:$0xff]  ;;  %v24_v29 = vld [vmem:[%s453_s0] sm:$0xff]  ;;  %s307_s1 = scalar_lea.vmem %s192_s27, 128 }
   0xb   :  { %v298_v28 = vpack.c.bf16 %v40_v27, %v39_v26  ;;  %v216_v32 = vld [vmem:[%s456_s3] ss:$0 sm:$0xff]  ;;  %p308_p0 = scmp.ne.s32.totalorder %s192_s27, %s307_s1  ;;  %p313_p2 = scmp.lt.s32.totalorder %s307_s1, %s307_s1 }
   0xc   :  { %276 = vmatpush3.bf16.xpose.msk.msra.mxu0 %vm369_vm1, %v274_v10 }
   0xd   :  { %277 = vmatprep.subr.bf16.mxu0 %v331_v2  ;;  %p314_p3 = por %p313_p2, %p312_p1 }
   0xf   :  { %p315_p4 = pnand %p314_p3, %p308_p0 }
  0x14   :  { %280 = vmatpush3.bf16.xpose.msk.msra.mxu0 %vm369_vm1, %v278_v13 }
  0x15   :  { %281 = vmatprep.subr.bf16.mxu0 %v331_v2 }
  0x1c   :  { %284 = vmatpush3.bf16.xpose.msk.msra.mxu0 %vm369_vm1, %v282_v16 }
  0x1d   :  { %285 = vmatprep.subr.bf16.mxu0 %v331_v2 }
  0x24   :  { %288 = vmatpush3.bf16.xpose.msk.msra.mxu0 %vm369_vm1, %v286_v19 }
  0x25   :  { %289 = vmatprep.subr.bf16.mxu0 %v331_v2 }
  0x2c   :  { %292 = vmatpush3.bf16.xpose.msk.msra.mxu0 %vm369_vm1, %v290_v22 }
  0x2d   :  { %293 = vmatprep.subr.bf16.mxu0 %v331_v2 }
  0x34   :  { %296 = vmatpush3.bf16.xpose.msk.msra.mxu0 %vm369_vm1, %v294_v25 }
  0x35   :  { %297 = vmatprep.subr.bf16.mxu0 %v331_v2 }
  0x3c   :  { %300 = vmatpush3.bf16.xpose.msk.msra.mxu0 %vm369_vm1, %v298_v28 }
  0x43   :  { %267 = vmatmul.mubr.msk.f32.vlgmr.msra.gmra.mrb[0].mxu0 %vm41_vm0, %v24_v29 }
  0x85   :  { %v173_v30 = vpop.permute.xlu0 %172 }
 0x116   :  { %v159_v31 = vpop.f32.mrb[0].mxu0 }
 0x117   :  { %v175_v33 = vmul.f32 %v173_v30, %v159_v31  ;;  %v268_v34 = vpop.f32.mrb[1].mxu0 }
 0x119   :  { %v183_v35 = vmul.f32 %v216_v32, %v175_v33 }
 0x11b   :  { %184 = vst [vmem:[#allocation3] sm:$0xff] %v183_v35 }
 0x11c   :  { %318 = shalt.err (!%p315_p4)
}
 0x11d   :  { %s319_s2 = scalar_lea.hbm %s457_s4, 128 }
 0x11e   :  { %p320_p5 = scmp.ne.s32.totalorder %s457_s4, %s319_s2  ;;  %p323_p6 = scmp.lt.u32.totalorder %s319_s2, %s457_s4 }
 0x120   :  { %p325_p7 = pnand %p323_p6, %p320_p5 }
 0x122   :  { %328 = shalt.err (!%p325_p7)
}
 0x123   :  { %194 = dma.vmem_to_hbm [thread:$0]  %s192_s27, 128, %s457_s4, [#allocation4]  }
 0x124   :  { %329 = dma.done.wait [#allocation4], 128  }
 0x125   :  { %330 = vsyncadd [#allocation4], 4294967168 }
 0x126   :  { %198 = vsyncpa [#allocation4], 1 }

</bundles_post_ra>
